<compile_context>
chip_gen: v5e
topology: v5e:2x2
jax: 0.10.0
libtpu: 0.0.40
codegen_flags: <defaults>
</compile_context>

<pallas_src>
from dataclasses import dataclass
from typing import List, Optional

import jax
import jax.numpy as jnp
from jax.experimental import pallas as pl
from jax.experimental.pallas import tpu as pltpu


# ----------------------------------------------------------------------------- helpers

def _round_up(x: int, m: int) -> int:
    return ((x + m - 1) // m) * m


def _vmem_capacity_bytes() -> int:
    """Physical per-core VMEM; conservative 64 MiB (v7x per-TC) fallback."""
    try:
        return int(pltpu.get_tpu_info().vmem_capacity_bytes)
    except Exception:
        return 64 * 1024 * 1024


# ----------------------------------------------------------------------------- fused kernel (small / medium operands)

@dataclass(frozen=True)
class _GroupPlan:
    loss_fn: str          # 'ce' | 'mse' | 'mae'
    loss_weight: float
    n_adv: int
    has_weights: bool     # class-weighted CE


def _build_fused_kernel(plan):
    """One kernel computing every group's weighted loss + the total."""

    def kernel(*refs):
        in_refs = refs[:-2]
        groups_out = refs[-2]          # SMEM (1, n_groups) f32
        total_out = refs[-1]           # SMEM (1, 1) f32
        pos = 0
        total = None
        for g, grp in enumerate(plan):
            adv_refs = in_refs[pos:pos + grp.n_adv]
            pos += grp.n_adv
            tgt_ref = in_refs[pos]
            pos += 1
            w_ref = None
            if grp.loss_fn == "ce" and grp.has_weights:
                w_ref = in_refs[pos]
                pos += 1

            if grp.loss_fn == "ce":
                Bg, Cg = adv_refs[0].shape
                # Shared per-group work (same targets for every adversary).
                t = tgt_ref[...].astype(jnp.int32)                     # (B, 1)
                eq = jax.lax.broadcasted_iota(jnp.int32, (Bg, Cg), 1) == t
                if w_ref is not None:
                    w = w_ref[...].astype(jnp.float32)                 # (1, C)
                    w_t = jnp.sum(jnp.where(eq, w, 0.0), axis=-1, keepdims=True)
                    den = jnp.sum(w_t)       # NaN if 0, matching PyTorch
                acc = None
                for a_ref in adv_refs:
                    x = a_ref[...].astype(jnp.float32)                 # (B, C)
                    m = jnp.max(x, axis=-1, keepdims=True)
                    lse = m + jnp.log(jnp.sum(jnp.exp(x - m), axis=-1,
                                              keepdims=True))
                    x_t = jnp.sum(jnp.where(eq, x, 0.0), axis=-1,
                                  keepdims=True)
                    nll = lse - x_t                                    # (B, 1)
                    if w_ref is None:
                        li = jnp.sum(nll) * jnp.float32(1.0 / Bg)
                    else:
                        li = jnp.sum(w_t * nll) / den
                    acc = li if acc is None else acc + li
            else:
                tgt = tgt_ref[...].astype(jnp.float32)                 # (1, B)
                acc = None
                for a_ref in adv_refs:
                    d = a_ref[...].astype(jnp.float32) - tgt
                    s = (jnp.sum(d * d) if grp.loss_fn == "mse"
                         else jnp.sum(jnp.abs(d)))
                    li = s * jnp.float32(1.0 / d.size)
                    acc = li if acc is None else acc + li

            gl = acc * jnp.float32(grp.loss_weight / grp.n_adv)
            groups_out[0, g] = gl
            total = gl if total is None else total + gl
        total_out[0, 0] = total

    return kernel


def _run_fused(plan, flat_args, vmem_limit_bytes=None):
    vmem = pl.BlockSpec(memory_space=pltpu.MemorySpace.VMEM)
    smem = pl.BlockSpec(memory_space=pltpu.MemorySpace.SMEM)
    cp = (pltpu.CompilerParams(vmem_limit_bytes=int(vmem_limit_bytes))
          if vmem_limit_bytes else None)
    groups, total = pl.pallas_call(
        _build_fused_kernel(tuple(plan)),
        out_shape=(jax.ShapeDtypeStruct((1, len(plan)), jnp.float32),
                   jax.ShapeDtypeStruct((1, 1), jnp.float32)),
        in_specs=[vmem] * len(flat_args),
        out_specs=(smem, smem),
        compiler_params=cp,
    )(*flat_args)
    return groups, total


# ----------------------------------------------------------------------------- batch-tiled cross entropy (large operands)

def _ce_tiled_kernel_factory(B, tb, tps, has_w):
    def kernel(*refs):
        if has_w:
            logits_ref, tgt_ref, w_ref, num_out, den_out = refs
        else:
            logits_ref, tgt_ref, num_out, den_out = refs
            w_ref = None
        c = pl.program_id(0)   # core-split index (parallel)
        i = pl.program_id(1)   # batch tile within split (reduction)

        @pl.when(i == 0)
        def _():
            num_out[...] = jnp.zeros_like(num_out)
            den_out[...] = jnp.zeros_like(den_out)

        x = logits_ref[...].astype(jnp.float32)                        # (tb, C)
        t = tgt_ref[...].astype(jnp.int32)                             # (tb, 1)
        eq = jax.lax.broadcasted_iota(jnp.int32, x.shape, 1) == t
        m = jnp.max(x, axis=-1, keepdims=True)
        lse = m + jnp.log(jnp.sum(jnp.exp(x - m), axis=-1, keepdims=True))
        x_t = jnp.sum(jnp.where(eq, x, 0.0), axis=-1, keepdims=True)
        nll = lse - x_t                                                # (tb, 1)
        if w_ref is None:
            w_t = jnp.ones_like(nll)
        else:
            w = w_ref[...].astype(jnp.float32)                         # (1, C)
            w_t = jnp.sum(jnp.where(eq, w, 0.0), axis=-1, keepdims=True)

        # Mask padded / duplicated (clamped-block) rows.  Keep the jnp.where
        # select (NOT multiply-by-mask): padded rows may contain NaN garbage.
        row = (jax.lax.broadcasted_iota(jnp.int32, (x.shape[0], 1), 0)
               + (c * tps + i) * tb)
        valid = row < B
        num_out[...] += jnp.sum(jnp.where(valid, w_t * nll, 0.0))
        den_out[...] += jnp.sum(jnp.where(valid, w_t, 0.0))

    return kernel


def ce_loss_tiled(logits, targets, class_weights=None, tb=None):
    """Batch-tiled (optionally class-weighted) cross entropy for large (B, C)."""
    B, C = logits.shape
    itemsize = logits.dtype.itemsize
    cap = _vmem_capacity_bytes()

    def _footprint(t_):
        # double-buffered logits tile + ~3 live f32 (t_, C) temporaries.
        return t_ * C * (2 * itemsize + 3 * 4) + 2 * t_ * 8 + 2 * C * 4

    if tb is None:
        budget = cap // 2
        tb = 8
        for cand in (1024, 512, 256, 128, 64, 32, 16, 8):
            if _footprint(cand) <= budget:
                tb = cand
                break
        # TODO(synk): add a C-tiled online-LSE variant for very large C so tb
        # never degrades to tiny tiles when a full (tb, C) row can't fit VMEM.
    tb = max(8, _round_up(min(int(tb), _round_up(B, 8)), 8))

    tiles = pl.cdiv(B, tb)
    # Leading "parallel" axis uses both v7x TensorCores; on 1-TC chips it just
    # runs sequentially (at most one duplicated-and-masked tile of waste).
    n_split = 2 if tiles >= 2 else 1
    tps = pl.cdiv(tiles, n_split)

    t2 = targets.reshape(B, 1)
    if not jnp.issubdtype(t2.dtype, jnp.integer):
        t2 = t2.astype(jnp.int32)
    has_w = class_weights is not None

    def blk(c, i):
        return (jnp.minimum(c * tps + i, tiles - 1), 0)

    in_specs = [pl.BlockSpec((tb, C), blk),
                pl.BlockSpec((tb, 1), blk)]
    args = [logits, t2]
    if has_w:
        in_specs.append(pl.BlockSpec((1, C), lambda c, i: (0, 0)))
        args.append(jnp.asarray(class_weights, jnp.float32).reshape(1, C))

    vmem_limit = int(min(cap * 0.8,
                         max(2 * _footprint(tb), 32 * 1024 * 1024)))
    cost = pl.CostEstimate(
        flops=int(8 * B * C),
        transcendentals=int(B * C),
        bytes_accessed=int(B * C * itemsize + B * 8 + (C * 4 if has_w else 0)))

    num, den = pl.pallas_call(
        _ce_tiled_kernel_factory(B, tb, tps, has_w),
        out_shape=(jax.ShapeDtypeStruct((n_split, 8, 128), jnp.float32),
                   jax.ShapeDtypeStruct((n_split, 8, 128), jnp.float32)),
        grid=(n_split, tps),
        in_specs=in_specs,
        out_specs=(pl.BlockSpec((1, 8, 128), lambda c, i: (c, 0, 0)),
                   pl.BlockSpec((1, 8, 128), lambda c, i: (c, 0, 0))),
        compiler_params=pltpu.CompilerParams(
            dimension_semantics=("parallel", "arbitrary"),
            vmem_limit_bytes=vmem_limit),
        cost_estimate=cost,
    )(*args)
    # Exact scalar division of the combined partials (no approx reciprocal).
    return jnp.sum(num[:, 0, 0]) / jnp.sum(den[:, 0, 0])


# ----------------------------------------------------------------------------- module

@dataclass
class AdvConfig:
    group_name: str
    type: str                    # 'categorical' or 'continuous'
    loss_fn: str                 # 'ce', 'mse', 'mae'
    loss_weight: float
    loss_class_weights: Optional[List[float]] = None


class AdvLosses:
    """JAX/Pallas port of advx-multvae AdvLosses.forward."""

    def __init__(self, adv_config: List[AdvConfig],
                 fused_budget_bytes: Optional[int] = None):
        self.adv_config = adv_config
        if fused_budget_bytes is None:
            # generation-aware: 1/8 of per-core VMEM (16 MiB v5e/v6e, 8 MiB v7x)
            fused_budget_bytes = _vmem_capacity_bytes() // 8
        self.fused_budget_bytes = fused_budget_bytes

    @staticmethod
    def _prepare_group(cfg: AdvConfig, inps, tgt):
        """Arrange one group's operands (native dtypes, lane-dense layouts)."""
        if cfg.type == "categorical" and not jnp.issubdtype(tgt.dtype, jnp.integer):
            # TODO(synk): PyTorch casts to int64; int32 is fine for realistic
            # class counts and keeps SMEM/VPU paths 32-bit.
            tgt = tgt.astype(jnp.int32)
        if cfg.loss_fn == "ce":
            C = inps[0].shape[-1]
            args = list(inps) + [tgt.reshape(-1, 1)]
            has_w = bool(cfg.loss_class_weights)
            if has_w:
                args.append(jnp.asarray(cfg.loss_class_weights,
                                        jnp.float32).reshape(1, C))
            return _GroupPlan("ce", float(cfg.loss_weight), len(inps), has_w), args
        # regression losses: lane-dense (1, B); float32 cast happens in-kernel.
        args = [p.reshape(1, -1) for p in inps] + [tgt.reshape(1, -1)]
        return _GroupPlan(cfg.loss_fn, float(cfg.loss_weight), len(inps), False), args

    def __call__(self, inputs, targets):
        plans, group_args = [], []
        for cfg, inp, tar in zip(self.adv_config, inputs, targets):
            plan, args = self._prepare_group(cfg, inp, tar)
            plans.append(plan)
            group_args.append(args)

        total_bytes = sum(a.size * a.dtype.itemsize
                          for args in group_args for a in args)
        cap = _vmem_capacity_bytes()
        if total_bytes <= self.fused_budget_bytes:
            # Single fused pallas_call: all adversaries, all groups, one launch.
            flat = [a for args in group_args for a in args]
            vmem_limit = int(min(cap * 0.8,
                                 max(6 * total_bytes, 32 * 1024 * 1024)))
            groups_arr, total_arr = _run_fused(plans, flat, vmem_limit)
            losses = {cfg.group_name: groups_arr[0, g]
                      for g, cfg in enumerate(self.adv_config)}
            return total_arr[0, 0], losses

        # Large-operand path: batch-tiled CE per adversary; regression groups
        # are still fused into one tiny kernel each.
        # TODO(synk): fuse a group's n_adv CE adversaries into one tiled launch
        # without an extra HBM stacking copy (needs per-adversary BlockSpecs
        # selected by a grid axis, which BlockSpec cannot express today).
        # TODO(synk): tile the regression losses as well for extremely large B.
        losses = {}
        for cfg, plan, args in zip(self.adv_config, plans, group_args):
            if plan.loss_fn == "ce":
                n = plan.n_adv
                tgt2 = args[n]
                w = args[n + 1] if plan.has_weights else None
                per = [ce_loss_tiled(l, tgt2, w) for l in args[:n]]
                gl = (sum(per) / n) * plan.loss_weight
            else:
                garr, _ = _run_fused([plan], list(args))
                gl = garr[0, 0]
            losses[cfg.group_name] = gl
        return sum(losses.values()), losses


# ----------------------------------------------------------------------------- reference (pure JAX)

def _ref_ce(logits, targets, w):
    logp = jax.nn.log_softmax(logits.astype(jnp.float32), axis=-1)
    t = targets.astype(jnp.int32)
    nll = -jnp.take_along_axis(logp, t[:, None], axis=1)[:, 0]
    if w is None:
        return jnp.mean(nll)
    wt = jnp.asarray(w, jnp.float32).reshape(-1)[t]
    return jnp.sum(wt * nll) / jnp.sum(wt)


def _reference(configs, inputs, targets):
    losses = {}
    for cfg, inp_list, tar in zip(configs, inputs, targets):
        per = []
        for inp in inp_list:
            if cfg.loss_fn == "ce":
                w = (jnp.asarray(cfg.loss_class_weights, jnp.float32)
                     if cfg.loss_class_weights else None)
                per.append(_ref_ce(inp, tar, w))
            elif cfg.loss_fn == "mse":
                d = inp.astype(jnp.float32) - tar.astype(jnp.float32).reshape(-1, 1)
                per.append(jnp.mean(d * d))
            else:
                d = inp.astype(jnp.float32) - tar.astype(jnp.float32).reshape(-1, 1)
                per.append(jnp.mean(jnp.abs(d)))
        losses[cfg.group_name] = (sum(per) / len(per)) * cfg.loss_weight
    return sum(losses.values()), losses


# ----------------------------------------------------------------------------- main

if __name__ == "__main__":
    key = jax.random.PRNGKey(0)
    B, C = 8, 4

    configs = [
        AdvConfig("gender", "categorical", "ce", 0.5,
                  loss_class_weights=[1.0, 2.0, 0.5, 1.5]),
        AdvConfig("age", "continuous", "mse", 1.0),
        AdvConfig("country", "continuous", "mae", 2.0),
        AdvConfig("occupation", "categorical", "ce", 0.7),   # unweighted CE
    ]

    keys = jax.random.split(key, 16)
    # group 0: two categorical adversaries, logits (B, C), int targets (B,)
    ce_inputs = [jax.random.normal(keys[0], (B, C), jnp.float32),
                 jax.random.normal(keys[1], (B, C), jnp.float32)]
    ce_targets = jax.random.randint(keys[2], (B,), 0, C, jnp.int32)
    # group 1: two regression adversaries (mse), preds (B, 1), targets (B,)
    mse_inputs = [jax.random.normal(keys[3], (B, 1), jnp.float32),
                  jax.random.normal(keys[4], (B, 1), jnp.float32)]
    mse_targets = jax.random.normal(keys[5], (B,), jnp.float32)
    # group 2: one regression adversary (mae)
    mae_inputs = [jax.random.normal(keys[6], (B, 1), jnp.float32)]
    mae_targets = jax.random.normal(keys[7], (B,), jnp.float32)
    # group 3: one categorical adversary, unweighted CE
    ce2_inputs = [jax.random.normal(keys[8], (B, C), jnp.float32)]
    ce2_targets = jax.random.randint(keys[9], (B,), 0, C, jnp.int32)

    inputs = [ce_inputs, mse_inputs, mae_inputs, ce2_inputs]
    targets = [ce_targets, mse_targets, mae_targets, ce2_targets]

    ref_total, ref_losses = _reference(configs, inputs, targets)

    # 1) Fused single-kernel path (default for small operands).
    module = AdvLosses(configs)
    total, losses = module(inputs, targets)
    total = jax.block_until_ready(total)
    assert jnp.allclose(total, ref_total, rtol=1e-5, atol=1e-5), (total, ref_total)
    for k in losses:
        assert jnp.allclose(losses[k], ref_losses[k], rtol=1e-5, atol=1e-5), (
            k, losses[k], ref_losses[k])

    # 2) Large-operand path, forced (batch-tiled CE + per-group fused regression).
    module_tiled = AdvLosses(configs, fused_budget_bytes=0)
    total2, losses2 = module_tiled(inputs, targets)
    total2 = jax.block_until_ready(total2)
    assert jnp.allclose(total2, ref_total, rtol=1e-4, atol=1e-5), (total2, ref_total)
    for k in losses2:
        assert jnp.allclose(losses2[k], ref_losses[k], rtol=1e-4, atol=1e-5), (
            k, losses2[k], ref_losses[k])

    # 3) Batch-tiled CE at a size that exercises the grid: 4 tiles split 2x2
    #    across the parallel axis, masked partial last tile, C not mult of 128.
    Bl, Cl = 1000, 200
    big_logits = jax.random.normal(keys[10], (Bl, Cl), jnp.float32)
    big_targets = jax.random.randint(keys[11], (Bl,), 0, Cl, jnp.int32)
    big_w = jax.random.uniform(keys[12], (Cl,), jnp.float32, 0.5, 2.0)
    tiled = jax.block_until_ready(
        ce_loss_tiled(big_logits, big_targets, big_w, tb=256))
    ref_big = _ref_ce(big_logits, big_targets, big_w)
    assert jnp.allclose(tiled, ref_big, rtol=1e-4, atol=1e-5), (tiled, ref_big)

    # 4) Odd tile count (3 tiles over a 2-way split) exercises the clamped
    #    duplicate block + row masking; unweighted CE.
    Bo = 600
    odd_logits = jax.random.normal(keys[13], (Bo, Cl), jnp.float32)
    odd_targets = jax.random.randint(keys[14], (Bo,), 0, Cl, jnp.int32)
    tiled_odd = jax.block_until_ready(
        ce_loss_tiled(odd_logits, odd_targets, None, tb=256))
    ref_odd = _ref_ce(odd_logits, odd_targets, None)
    assert jnp.allclose(tiled_odd, ref_odd, rtol=1e-4, atol=1e-5), (tiled_odd, ref_odd)

    print("KERNEL_OK")
</pallas_src>

<mosaic_0001>
module attributes {stable_mosaic.version = 11 : i64} {
  func.func @kernel(%arg0: memref<8x4xf32, #tpu.memory_space<vmem>>, %arg1: memref<8x4xf32, #tpu.memory_space<vmem>>, %arg2: memref<8x1xi32, #tpu.memory_space<vmem>>, %arg3: memref<1x4xf32, #tpu.memory_space<vmem>>, %arg4: memref<1x8xf32, #tpu.memory_space<vmem>>, %arg5: memref<1x8xf32, #tpu.memory_space<vmem>>, %arg6: memref<1x8xf32, #tpu.memory_space<vmem>>, %arg7: memref<1x8xf32, #tpu.memory_space<vmem>>, %arg8: memref<1x8xf32, #tpu.memory_space<vmem>>, %arg9: memref<8x4xf32, #tpu.memory_space<vmem>>, %arg10: memref<8x1xi32, #tpu.memory_space<vmem>>, %arg11: memref<1x4xf32, #tpu.memory_space<smem>>, %arg12: memref<1x1xf32, #tpu.memory_space<smem>>) attributes {dimension_semantics = [], scalar_prefetch = 0 : i64, scratch_operands = 0 : i64, tpu.core_type = #tpu.core_type<tc>} {
    %c0 = arith.constant 0 : index
    %c0_0 = arith.constant 0 : index
    %0 = vector.load %arg2[%c0, %c0_0] : memref<8x1xi32, #tpu.memory_space<vmem>>, vector<8x1xi32>
    %1 = tpu.iota {dimensions = array<i32: 1>} : vector<8x4xi32>
    %2 = vector.broadcast %0 : vector<8x1xi32> to vector<8x4xi32>
    %3 = arith.cmpi eq, %1, %2 : vector<8x4xi32>
    %c0_1 = arith.constant 0 : index
    %c0_2 = arith.constant 0 : index
    %4 = vector.load %arg3[%c0_1, %c0_2] : memref<1x4xf32, #tpu.memory_space<vmem>>, vector<1x4xf32>
    %cst = arith.constant 0.000000e+00 : f32
    %5 = vector.shape_cast %4 : vector<1x4xf32> to vector<1x4xf32>
    %6 = vector.broadcast %5 : vector<1x4xf32> to vector<8x4xf32>
    %7 = vector.broadcast %cst : f32 to vector<8x4xf32>
    %8 = arith.select %3, %6, %7 : vector<8x4xi1>, vector<8x4xf32>
    %cst_3 = arith.constant dense<0.000000e+00> : vector<8xf32>
    %9 = vector.multi_reduction <add>, %8, %cst_3 [1] : vector<8x4xf32> to vector<8xf32>
    %10 = vector.shape_cast %9 : vector<8xf32> to vector<8x1xf32>
    %11 = vector.shape_cast %10 : vector<8x1xf32> to vector<1x8x1xf32>
    %cst_4 = arith.constant dense<0.000000e+00> : vector<1xf32>
    %12 = vector.multi_reduction <add>, %11, %cst_4 [1, 2] : vector<1x8x1xf32> to vector<1xf32>
    %13 = vector.shape_cast %12 : vector<1xf32> to vector<1x1x1xf32>
    %14 = vector.extract %13[0, 0, 0] : f32 from vector<1x1x1xf32>
    %c0_5 = arith.constant 0 : index
    %c0_6 = arith.constant 0 : index
    %15 = vector.load %arg0[%c0_5, %c0_6] : memref<8x4xf32, #tpu.memory_space<vmem>>, vector<8x4xf32>
    %cst_7 = arith.constant dense<0xFF800000> : vector<8xf32>
    %16 = vector.multi_reduction <maximumf>, %15, %cst_7 [1] : vector<8x4xf32> to vector<8xf32>
    %17 = vector.shape_cast %16 : vector<8xf32> to vector<8x1xf32>
    %18 = vector.broadcast %17 : vector<8x1xf32> to vector<8x4xf32>
    %19 = arith.subf %15, %18 : vector<8x4xf32>
    %20 = math.exp %19 : vector<8x4xf32>
    %cst_8 = arith.constant dense<0.000000e+00> : vector<8xf32>
    %21 = vector.multi_reduction <add>, %20, %cst_8 [1] : vector<8x4xf32> to vector<8xf32>
    %22 = vector.shape_cast %21 : vector<8xf32> to vector<8x1xf32>
    %23 = math.log %22 : vector<8x1xf32>
    %24 = arith.addf %17, %23 : vector<8x1xf32>
    %cst_9 = arith.constant 0.000000e+00 : f32
    %25 = vector.broadcast %cst_9 : f32 to vector<8x4xf32>
    %26 = arith.select %3, %15, %25 : vector<8x4xi1>, vector<8x4xf32>
    %cst_10 = arith.constant dense<0.000000e+00> : vector<8xf32>
    %27 = vector.multi_reduction <add>, %26, %cst_10 [1] : vector<8x4xf32> to vector<8xf32>
    %28 = vector.shape_cast %27 : vector<8xf32> to vector<8x1xf32>
    %29 = arith.subf %24, %28 : vector<8x1xf32>
    %30 = arith.mulf %10, %29 : vector<8x1xf32>
    %31 = vector.shape_cast %30 : vector<8x1xf32> to vector<1x8x1xf32>
    %cst_11 = arith.constant dense<0.000000e+00> : vector<1xf32>
    %32 = vector.multi_reduction <add>, %31, %cst_11 [1, 2] : vector<1x8x1xf32> to vector<1xf32>
    %33 = vector.shape_cast %32 : vector<1xf32> to vector<1x1x1xf32>
    %34 = vector.extract %33[0, 0, 0] : f32 from vector<1x1x1xf32>
    %35 = arith.divf %34, %14 : f32
    %c0_12 = arith.constant 0 : index
    %c0_13 = arith.constant 0 : index
    %36 = vector.load %arg1[%c0_12, %c0_13] : memref<8x4xf32, #tpu.memory_space<vmem>>, vector<8x4xf32>
    %cst_14 = arith.constant dense<0xFF800000> : vector<8xf32>
    %37 = vector.multi_reduction <maximumf>, %36, %cst_14 [1] : vector<8x4xf32> to vector<8xf32>
    %38 = vector.shape_cast %37 : vector<8xf32> to vector<8x1xf32>
    %39 = vector.broadcast %38 : vector<8x1xf32> to vector<8x4xf32>
    %40 = arith.subf %36, %39 : vector<8x4xf32>
    %41 = math.exp %40 : vector<8x4xf32>
    %cst_15 = arith.constant dense<0.000000e+00> : vector<8xf32>
    %42 = vector.multi_reduction <add>, %41, %cst_15 [1] : vector<8x4xf32> to vector<8xf32>
    %43 = vector.shape_cast %42 : vector<8xf32> to vector<8x1xf32>
    %44 = math.log %43 : vector<8x1xf32>
    %45 = arith.addf %38, %44 : vector<8x1xf32>
    %cst_16 = arith.constant 0.000000e+00 : f32
    %46 = vector.broadcast %cst_16 : f32 to vector<8x4xf32>
    %47 = arith.select %3, %36, %46 : vector<8x4xi1>, vector<8x4xf32>
    %cst_17 = arith.constant dense<0.000000e+00> : vector<8xf32>
    %48 = vector.multi_reduction <add>, %47, %cst_17 [1] : vector<8x4xf32> to vector<8xf32>
    %49 = vector.shape_cast %48 : vector<8xf32> to vector<8x1xf32>
    %50 = arith.subf %45, %49 : vector<8x1xf32>
    %51 = arith.mulf %10, %50 : vector<8x1xf32>
    %52 = vector.shape_cast %51 : vector<8x1xf32> to vector<1x8x1xf32>
    %cst_18 = arith.constant dense<0.000000e+00> : vector<1xf32>
    %53 = vector.multi_reduction <add>, %52, %cst_18 [1, 2] : vector<1x8x1xf32> to vector<1xf32>
    %54 = vector.shape_cast %53 : vector<1xf32> to vector<1x1x1xf32>
    %55 = vector.extract %54[0, 0, 0] : f32 from vector<1x1x1xf32>
    %56 = arith.divf %55, %14 : f32
    %57 = arith.addf %35, %56 : f32
    %cst_19 = arith.constant 2.500000e-01 : f32
    %58 = arith.mulf %57, %cst_19 : f32
    %c0_20 = arith.constant 0 : index
    %c0_21 = arith.constant 0 : index
    %59 = memref.load %arg11[%c0_20, %c0_21] : memref<1x4xf32, #tpu.memory_space<smem>>
    memref.store %58, %arg11[%c0_20, %c0_21] : memref<1x4xf32, #tpu.memory_space<smem>>
    %c0_22 = arith.constant 0 : index
    %c0_23 = arith.constant 0 : index
    %60 = vector.load %arg6[%c0_22, %c0_23] : memref<1x8xf32, #tpu.memory_space<vmem>>, vector<1x8xf32>
    %c0_24 = arith.constant 0 : index
    %c0_25 = arith.constant 0 : index
    %61 = vector.load %arg4[%c0_24, %c0_25] : memref<1x8xf32, #tpu.memory_space<vmem>>, vector<1x8xf32>
    %62 = arith.subf %61, %60 : vector<1x8xf32>
    %63 = arith.mulf %62, %62 : vector<1x8xf32>
    %64 = vector.shape_cast %63 : vector<1x8xf32> to vector<1x1x8xf32>
    %cst_26 = arith.constant dense<0.000000e+00> : vector<1xf32>
    %65 = vector.multi_reduction <add>, %64, %cst_26 [1, 2] : vector<1x1x8xf32> to vector<1xf32>
    %66 = vector.shape_cast %65 : vector<1xf32> to vector<1x1x1xf32>
    %67 = vector.extract %66[0, 0, 0] : f32 from vector<1x1x1xf32>
    %cst_27 = arith.constant 1.250000e-01 : f32
    %68 = arith.mulf %67, %cst_27 : f32
    %c0_28 = arith.constant 0 : index
    %c0_29 = arith.constant 0 : index
    %69 = vector.load %arg5[%c0_28, %c0_29] : memref<1x8xf32, #tpu.memory_space<vmem>>, vector<1x8xf32>
    %70 = arith.subf %69, %60 : vector<1x8xf32>
    %71 = arith.mulf %70, %70 : vector<1x8xf32>
    %72 = vector.shape_cast %71 : vector<1x8xf32> to vector<1x1x8xf32>
    %cst_30 = arith.constant dense<0.000000e+00> : vector<1xf32>
    %73 = vector.multi_reduction <add>, %72, %cst_30 [1, 2] : vector<1x1x8xf32> to vector<1xf32>
    %74 = vector.shape_cast %73 : vector<1xf32> to vector<1x1x1xf32>
    %75 = vector.extract %74[0, 0, 0] : f32 from vector<1x1x1xf32>
    %cst_31 = arith.constant 1.250000e-01 : f32
    %76 = arith.mulf %75, %cst_31 : f32
    %77 = arith.addf %68, %76 : f32
    %cst_32 = arith.constant 5.000000e-01 : f32
    %78 = arith.mulf %77, %cst_32 : f32
    %c0_33 = arith.constant 0 : index
    %c1 = arith.constant 1 : index
    %79 = memref.load %arg11[%c0_33, %c1] : memref<1x4xf32, #tpu.memory_space<smem>>
    memref.store %78, %arg11[%c0_33, %c1] : memref<1x4xf32, #tpu.memory_space<smem>>
    %80 = arith.addf %58, %78 : f32
    %c0_34 = arith.constant 0 : index
    %c0_35 = arith.constant 0 : index
    %81 = vector.load %arg8[%c0_34, %c0_35] : memref<1x8xf32, #tpu.memory_space<vmem>>, vector<1x8xf32>
    %c0_36 = arith.constant 0 : index
    %c0_37 = arith.constant 0 : index
    %82 = vector.load %arg7[%c0_36, %c0_37] : memref<1x8xf32, #tpu.memory_space<vmem>>, vector<1x8xf32>
    %83 = arith.subf %82, %81 : vector<1x8xf32>
    %84 = math.absf %83 : vector<1x8xf32>
    %85 = vector.shape_cast %84 : vector<1x8xf32> to vector<1x1x8xf32>
    %cst_38 = arith.constant dense<0.000000e+00> : vector<1xf32>
    %86 = vector.multi_reduction <add>, %85, %cst_38 [1, 2] : vector<1x1x8xf32> to vector<1xf32>
    %87 = vector.shape_cast %86 : vector<1xf32> to vector<1x1x1xf32>
    %88 = vector.extract %87[0, 0, 0] : f32 from vector<1x1x1xf32>
    %cst_39 = arith.constant 1.250000e-01 : f32
    %89 = arith.mulf %88, %cst_39 : f32
    %cst_40 = arith.constant 2.000000e+00 : f32
    %90 = arith.mulf %89, %cst_40 : f32
    %c0_41 = arith.constant 0 : index
    %c2 = arith.constant 2 : index
    %91 = memref.load %arg11[%c0_41, %c2] : memref<1x4xf32, #tpu.memory_space<smem>>
    memref.store %90, %arg11[%c0_41, %c2] : memref<1x4xf32, #tpu.memory_space<smem>>
    %92 = arith.addf %80, %90 : f32
    %c0_42 = arith.constant 0 : index
    %c0_43 = arith.constant 0 : index
    %93 = vector.load %arg10[%c0_42, %c0_43] : memref<8x1xi32, #tpu.memory_space<vmem>>, vector<8x1xi32>
    %94 = tpu.iota {dimensions = array<i32: 1>} : vector<8x4xi32>
    %95 = vector.broadcast %93 : vector<8x1xi32> to vector<8x4xi32>
    %96 = arith.cmpi eq, %94, %95 : vector<8x4xi32>
    %c0_44 = arith.constant 0 : index
    %c0_45 = arith.constant 0 : index
    %97 = vector.load %arg9[%c0_44, %c0_45] : memref<8x4xf32, #tpu.memory_space<vmem>>, vector<8x4xf32>
    %cst_46 = arith.constant dense<0xFF800000> : vector<8xf32>
    %98 = vector.multi_reduction <maximumf>, %97, %cst_46 [1] : vector<8x4xf32> to vector<8xf32>
    %99 = vector.shape_cast %98 : vector<8xf32> to vector<8x1xf32>
    %100 = vector.broadcast %99 : vector<8x1xf32> to vector<8x4xf32>
    %101 = arith.subf %97, %100 : vector<8x4xf32>
    %102 = math.exp %101 : vector<8x4xf32>
    %cst_47 = arith.constant dense<0.000000e+00> : vector<8xf32>
    %103 = vector.multi_reduction <add>, %102, %cst_47 [1] : vector<8x4xf32> to vector<8xf32>
    %104 = vector.shape_cast %103 : vector<8xf32> to vector<8x1xf32>
    %105 = math.log %104 : vector<8x1xf32>
    %106 = arith.addf %99, %105 : vector<8x1xf32>
    %cst_48 = arith.constant 0.000000e+00 : f32
    %107 = vector.broadcast %cst_48 : f32 to vector<8x4xf32>
    %108 = arith.select %96, %97, %107 : vector<8x4xi1>, vector<8x4xf32>
    %cst_49 = arith.constant dense<0.000000e+00> : vector<8xf32>
    %109 = vector.multi_reduction <add>, %108, %cst_49 [1] : vector<8x4xf32> to vector<8xf32>
    %110 = vector.shape_cast %109 : vector<8xf32> to vector<8x1xf32>
    %111 = arith.subf %106, %110 : vector<8x1xf32>
    %112 = vector.shape_cast %111 : vector<8x1xf32> to vector<1x8x1xf32>
    %cst_50 = arith.constant dense<0.000000e+00> : vector<1xf32>
    %113 = vector.multi_reduction <add>, %112, %cst_50 [1, 2] : vector<1x8x1xf32> to vector<1xf32>
    %114 = vector.shape_cast %113 : vector<1xf32> to vector<1x1x1xf32>
    %115 = vector.extract %114[0, 0, 0] : f32 from vector<1x1x1xf32>
    %cst_51 = arith.constant 1.250000e-01 : f32
    %116 = arith.mulf %115, %cst_51 : f32
    %cst_52 = arith.constant 0.699999988 : f32
    %117 = arith.mulf %116, %cst_52 : f32
    %c0_53 = arith.constant 0 : index
    %c3 = arith.constant 3 : index
    %118 = memref.load %arg11[%c0_53, %c3] : memref<1x4xf32, #tpu.memory_space<smem>>
    memref.store %117, %arg11[%c0_53, %c3] : memref<1x4xf32, #tpu.memory_space<smem>>
    %119 = arith.addf %92, %117 : f32
    %c0_54 = arith.constant 0 : index
    %c0_55 = arith.constant 0 : index
    %120 = memref.load %arg12[%c0_54, %c0_55] : memref<1x1xf32, #tpu.memory_space<smem>>
    memref.store %119, %arg12[%c0_54, %c0_55] : memref<1x1xf32, #tpu.memory_space<smem>>
    return
  }
}

</mosaic_0001>

<bundles_post_ra>
// kernel: tpu_custom_call.1
= control target key start
LH: loop header
LB: loop body
LE: loop exit
PB: predicated region body
PF: predicated region fallthrough
CT: control target
= control target key end

     0   :  { %18 = vsyncpa [#allocation3], 0  ;;  %vm54_vm0 = vcmask 31744   ;;  %v352_v3 = vmov 0   ;;  %s483_s0 = inlined_call_operand.vmem [shape: f32[8,4], index: 0, kind: input, shape index: {}]   ;;  %s484_s1 = inlined_call_operand.vmem [shape: f32[8,4], index: 1, kind: input, shape index: {}]   ;;  %s485_s2 = inlined_call_operand.vmem [shape: s32[8,1], index: 2, kind: input, shape index: {}]   ;;  %s486_s3 = inlined_call_operand.vmem [shape: f32[1,4], index: 3, kind: input, shape index: {}]   ;;  %s487_s4 = inlined_call_operand.vmem [shape: f32[1,8], index: 4, kind: input, shape index: {}]   ;;  %s488_s5 = inlined_call_operand.vmem [shape: f32[1,8], index: 5, kind: input, shape index: {}]   ;;  %s489_s6 = inlined_call_operand.vmem [shape: f32[1,8], index: 6, kind: input, shape index: {}]   ;;  %s490_s7 = inlined_call_operand.vmem [shape: f32[1,8], index: 7, kind: input, shape index: {}]   ;;  %s491_s8 = inlined_call_operand.vmem [shape: f32[1,8], index: 8, kind: input, shape index: {}]   ;;  %s492_s9 = inlined_call_operand.vmem [shape: f32[8,4], index: 9, kind: input, shape index: {}]   ;;  %s493_s10 = inlined_call_operand.vmem [shape: s32[8,1], index: 10, kind: input, shape index: {}]   ;;  %s494_s11 = inlined_call_operand.hbm [shape: f32[1,4], index: 11, kind: output, shape index: {0}]   ;;  %s495_s12 = inlined_call_operand.hbm [shape: f32[1,1], index: 12, kind: output, shape index: {1}]  }
   0x1   :  { %v224_v0 = vld [vmem:[%s492_s9] sm:$0xff]  ;;  %307 = vset.pattern.permute.xlu0 %v352_v3  ;;  %308 = vset.pattern.permute.xlu2 %v352_v3 }
   0x2   :  { %v69_v1 = vld [vmem:[%s483_s0] sm:$0xff]  ;;  %v225_v4 = vsel %vm54_vm0, %v224_v0, -inf }
   0x3   :  { %v42_v2 = vld [vmem:[%s485_s2] sm:$0xff]  ;;  %v70_v5 = vsel %vm54_vm0, %v69_v1, -inf  ;;  %226 = vmax.xlane.f32.xlu2 %v225_v4 }
   0x4   :  { %71 = vmax.xlane.f32.xlu1 %v70_v5 }
   0x5   :  { %19 = vsyncpa [#allocation5], 0  ;;  %46 = vperm.xlu0 %307, %v42_v2   ;;  %v219_v6 = vld [vmem:[%s493_s10] sm:$0xff]  ;;  %v43_v9 = vlaneseq  ;;  %vm58_vm3 = vcmask 7168   ;;  %vm169_vm4 = vcmask 57344   ;;  %s273_s13 = sshll.u32 %s495_s12, 4  ;;  %s274_s13 = int_to_ptr.hbm [resolvable:$true] %s273_s13 }
   0x6   :  { %v115_v7 = vld [vmem:[%s484_s1] sm:$0xff]  ;;  %s353_s16 = smov [#allocation2]  }
   0x7   :  { %v116_v8 = vsel %vm54_vm0, %v115_v7, -inf  ;;  %v44_v10 = vand.u32 127, %v43_v9  ;;  %v309_v11 = vld [vmem:[%s486_s3] ss:$0 sm:$0xff]  ;;  %s264_s3 = sshll.u32 %s494_s11, 4  ;;  %s265_s3 = int_to_ptr.hbm [resolvable:$true] %s264_s3 }
   0x8   :  { %v165_v46 = vld [vmem:[%s489_s6] sm:$0x1] }
   0x9   :  { %v166_v47 = vld [vmem:[%s487_s4] sm:$0x1] }
   0xa   :  { %v167_v48 = vsub.f32 %v166_v47, %v165_v46  ;;  %v201_v2 = vld [vmem:[%s490_s7] sm:$0x1] }
   0xc   :  { %117 = vmax.xlane.f32.xlu1 %v116_v8  ;;  %v168_v49 = vmul.f32 %v167_v48, %v167_v48 }
   0xe   :  { %v170_v50 = vsel %vm169_vm4, %v168_v49, 0.0 }
  0x1b   :  { %221 = vperm.xlu2 %308, %v219_v6  }
  0x76   :  { %v227_v13 = vpop.xlane.xlu2 %226 }
  0x77   :  { %v47_v12 = vpop.permute.xlu0 %46  ;;  %v228_v14 = vsub.f32 %v224_v0, %v227_v13  ;;  %v441_v15 = vpop.xlane.xlu1 %71 }
  0x78   :  { %vm48_vm1 = vcmp.eq.s32.totalorder %v44_v10, %v47_v12  ;;  %v73_v16 = vsub.f32 %v69_v1, %v441_v15 }
  0x79   :  { %v53_v17 = vsel %vm48_vm1, %v309_v11, 0.0  ;;  %v229_v18 = vmul.f32 1.442695, %v228_v14  ;;  %v82_v36 = vsel %vm48_vm1, %v69_v1, 0.0  ;;  %v128_v43 = vsel %vm48_vm1, %v115_v7, 0.0 }
  0x7a   :  { %v55_v19 = vsel %vm54_vm0, %v53_v17, 0.0  ;;  %v74_v20 = vmul.f32 1.442695, %v73_v16  ;;  %v83_v39 = vsel %vm54_vm0, %v82_v36, 0.0  ;;  %v129_v45 = vsel %vm54_vm0, %v128_v43, 0.0 }
  0x7b   :  { %56 = vadd.xlane.f32.xlu0 %v55_v19  ;;  %310 = vpow2.f32 %v229_v18  ;;  %v200_v1 = vld [vmem:[%s491_s8] sm:$0x1] }
  0x7c   :  { %312 = vpow2.f32 %v74_v20  ;;  %v202_v6 = vsub.f32 %v201_v2, %v200_v1  ;;  %v181_v11 = vld [vmem:[%s488_s5] sm:$0x1] }
  0x7e   :  { %v222_v21 = vpop.permute.xlu2 %221  ;;  %v203_v9 = vand.u32 2147483647, %v202_v6 }
  0x7f   :  { %vm223_vm2 = vcmp.eq.s32.totalorder %v44_v10, %v222_v21  ;;  %v118_v28 = vpop.xlane.xlu1 %117 }
  0x80   :  { %v237_v22 = vsel %vm223_vm2, %v224_v0, 0.0  ;;  %v119_v29 = vsub.f32 %v115_v7, %v118_v28  ;;  %v204_v14 = vsel %vm169_vm4, %v203_v9, 0.0 }
  0x81   :  { %v311_v23 = vpop.eup %310  ;;  %v238_v24 = vsel %vm54_vm0, %v237_v22, 0.0 }
  0x82   :  { %v313_v25 = vpop.eup %312  ;;  %v231_v26 = vsel %vm54_vm0, %v311_v23, 0.0  ;;  %v120_v30 = vmul.f32 1.442695, %v119_v29 }
  0x83   :  { %239 = vadd.xlane.f32.xlu0 %v238_v24  ;;  %v76_v27 = vsel %vm54_vm0, %v313_v25, 0.0  ;;  %232 = vadd.xlane.f32.xlu2 %v231_v26 }
  0x84   :  { %77 = vadd.xlane.f32.xlu1 %v76_v27  ;;  %314 = vpow2.f32 %v120_v30 }
  0x8a   :  { %v315_v33 = vpop.eup %314 }
  0x8b   :  { %v122_v34 = vsel %vm54_vm0, %v315_v33, 0.0 }
  0xee   :  { %v57_v31 = vpop.xlane.xlu0 %56 }
  0xef   :  { %v59_v32 = vsel %vm58_vm3, %v57_v31, 0.0 }
  0xf0   :  { %60 = vadd.xlane.f32.xlu1 %v59_v32 }
  0xf6   :  { %v233_v35 = vpop.xlane.xlu2 %232  ;;  %v240_v40 = vpop.xlane.xlu0 %239 }
  0xf7   :  { %316 = vlog2.f32 %v233_v35  ;;  %v78_v51 = vpop.xlane.xlu1 %77 }
  0xf8   :  { %123 = vadd.xlane.f32.xlu1 %v122_v34  ;;  %318 = vlog2.f32 %v78_v51 }
  0xfd   :  { %v317_v37 = vpop.eup %316 }
  0xfe   :  { %v235_v38 = vmul.f32 0.6931472, %v317_v37  ;;  %v319_v57 = vpop.eup %318 }
  0xff   :  { %v80_v60 = vmul.f32 0.6931472, %v319_v57 }
 0x100   :  { %84 = vadd.xlane.f32.xlu1 %v83_v39  ;;  %v236_v41 = vadd.f32 %v235_v38, %v227_v13 }
 0x101   :  { %v81_v62 = vadd.f32 %v80_v60, %v441_v15  ;;  %v182_v15 = vsub.f32 %v181_v11, %v165_v46 }
 0x102   :  { %v241_v42 = vsub.f32 %v236_v41, %v240_v40 }
 0x103   :  { %v183_v17 = vmul.f32 %v182_v15, %v182_v15 }
 0x104   :  { %v242_v44 = vsel %vm58_vm3, %v241_v42, 0.0 }
 0x105   :  { %243 = vadd.xlane.f32.xlu2 %v242_v44  ;;  %v184_v18 = vsel %vm169_vm4, %v183_v17, 0.0 }
 0x108   :  { %130 = vadd.xlane.f32.xlu1 %v129_v45 }
 0x110   :  { %171 = vadd.xlane.f32.xlu1 %v170_v50 }
 0x163   :  { %v61_v52 = vpop.xlane.xlu1 %60 }
 0x164   :  { %v62_v53 = vrot.slane %v61_v52, 4 }
 0x166   :  { %v63_v54 = vadd.f32 %v62_v53, %v61_v52 }
 0x168   :  { %v64_v55 = vrot.slane %v63_v54, 2 }
 0x16a   :  { %v65_v56 = vadd.f32 %v64_v55, %v63_v54 }
 0x16b   :  { %v124_v58 = vpop.xlane.xlu1 %123 }
 0x16c   :  { %v66_v59 = vrot.slane %v65_v56, 1  ;;  %320 = vlog2.f32 %v124_v58 }
 0x16e   :  { %v67_v61 = vadd.f32 %v66_v59, %v65_v56 }
 0x170   :  { %288 = vpush %v67_v61 }
 0x172   :  { %v321_v63 = vpop.eup %320 }
 0x173   :  { %v85_v0 = vpop.xlane.xlu1 %84  ;;  %v126_v4 = vmul.f32 0.6931472, %v321_v63 }
 0x174   :  { %v86_v3 = vsub.f32 %v81_v62, %v85_v0 }
 0x175   :  { %v127_v8 = vadd.f32 %v126_v4, %v118_v28 }
 0x176   :  { %v87_v5 = vmul.f32 %v86_v3, %v57_v31 }
 0x178   :  { %v88_v7 = vsel %vm58_vm3, %v87_v5, 0.0 }
 0x179   :  { %89 = vadd.xlane.f32.xlu1 %v88_v7 }
 0x17b   :  { %v131_v10 = vpop.xlane.xlu1 %130 }
 0x17c   :  { %v132_v12 = vsub.f32 %v127_v8, %v131_v10 }
 0x17e   :  { %v133_v13 = vmul.f32 %v132_v12, %v57_v31  ;;  %v244_v31 = vpop.xlane.xlu2 %243 }
 0x17f   :  { %v245_v39 = vrot.slane %v244_v31, 4 }
 0x180   :  { %v134_v16 = vsel %vm58_vm3, %v133_v13, 0.0 }
 0x181   :  { %135 = vadd.xlane.f32.xlu0 %v134_v16  ;;  %205 = vadd.xlane.f32.xlu1 %v204_v14  ;;  %v246_v49 = vadd.f32 %v245_v39, %v244_v31 }
 0x183   :  { %v172_v20 = vpop.xlane.xlu1 %171  ;;  %v247_v56 = vrot.slane %v246_v49, 2 }
 0x184   :  { %v173_v24 = vrot.slane %v172_v20, 4 }
 0x185   :  { %v248_v63 = vadd.f32 %v247_v56, %v246_v49 }
 0x186   :  { %v174_v29 = vadd.f32 %v173_v24, %v172_v20 }
 0x187   :  { %v249_v4 = vrot.slane %v248_v63, 1 }
 0x188   :  { %v175_v35 = vrot.slane %v174_v29, 2 }
 0x189   :  { %185 = vadd.xlane.f32.xlu0 %v184_v18  ;;  %v250_v7 = vadd.f32 %v249_v4, %v248_v63 }
 0x18a   :  { %v176_v48 = vadd.f32 %v175_v35, %v174_v29 }
 0x18c   :  { %v177_v55 = vrot.slane %v176_v48, 1 }
 0x18e   :  { %v178_v62 = vadd.f32 %v177_v55, %v176_v48 }
 0x1a1   :  { %s289_s7 = spop %288 }
 0x1a2   :  { %v98_v19 = vstv %s289_s7 }
 0x1a3   :  { %322 = vrcp.f32 %v98_v19  ;;  %v110_v34 = vand.u32 2147483648, %v98_v19  ;;  %vm104_vm6 = vweird.f32 %v98_v19  ;;  %v108_v37 = vand.u32 2147483647, %v98_v19 }
 0x1a5   :  { %v111_v46 = vor.u32 1.1754944e-38, %v110_v34  ;;  %vm109_vm8 = vcmp.eq.f32.partialorder %v108_v37, 8.507059e+37 }
 0x1a9   :  { %v323_v21 = vpop.eup %322 }
 0x1aa   :  { %v100_v22 = vmul.f32 %v323_v21, %v98_v19  ;;  %vm105_vm5 = vweird.f32 %v323_v21 }
 0x1ab   :  { %vm106_vm7 = vmor %vm104_vm6, %vm105_vm5 }
 0x1ac   :  { %v101_v23 = vsub.f32 1.0, %v100_v22 }
 0x1ae   :  { %v102_v27 = vmul.f32 %v323_v21, %v101_v23 }
 0x1b0   :  { %v103_v32 = vadd.f32 %v323_v21, %v102_v27 }
 0x1b2   :  { %v107_v43 = vsel %vm106_vm7, %v323_v21, %v103_v32 }
 0x1b3   :  { %v112_v51 = vsel %vm109_vm8, %v111_v46, %v107_v43 }
 0x1ec   :  { %v90_v25 = vpop.xlane.xlu1 %89 }
 0x1ed   :  { %v91_v26 = vrot.slane %v90_v25, 4 }
 0x1ef   :  { %v92_v28 = vadd.f32 %v91_v26, %v90_v25 }
 0x1f1   :  { %v93_v30 = vrot.slane %v92_v28, 2 }
 0x1f3   :  { %v94_v33 = vadd.f32 %v93_v30, %v92_v28 }
 0x1f4   :  { %v136_v36 = vpop.xlane.xlu0 %135  ;;  %v206_v38 = vpop.xlane.xlu1 %205 }
 0x1f5   :  { %v137_v40 = vrot.slane %v136_v36, 4  ;;  %v95_v41 = vrot.slane %v94_v33, 1  ;;  %v207_v42 = vrot.slane %v206_v38, 4 }
 0x1f7   :  { %v138_v44 = vadd.f32 %v137_v40, %v136_v36  ;;  %v96_v45 = vadd.f32 %v95_v41, %v94_v33  ;;  %v208_v47 = vadd.f32 %v207_v42, %v206_v38 }
 0x1f9   :  { %v139_v50 = vrot.slane %v138_v44, 2  ;;  %290 = vpush %v96_v45  ;;  %v209_v53 = vrot.slane %v208_v47, 2 }
 0x1fa   :  { %292 = vpush %v112_v51 }
 0x1fb   :  { %v140_v52 = vadd.f32 %v139_v50, %v138_v44  ;;  %v210_v61 = vadd.f32 %v209_v53, %v208_v47 }
 0x1fc   :  { %v186_v54 = vpop.xlane.xlu0 %185 }
 0x1fd   :  { %v187_v57 = vrot.slane %v186_v54, 4  ;;  %v141_v58 = vrot.slane %v140_v52, 1  ;;  %v211_v2 = vrot.slane %v210_v61, 1 }
 0x1ff   :  { %v188_v59 = vadd.f32 %v187_v57, %v186_v54  ;;  %v142_v60 = vadd.f32 %v141_v58, %v140_v52  ;;  %v212_v6 = vadd.f32 %v211_v2, %v210_v61 }
 0x201   :  { %v189_v0 = vrot.slane %v188_v59, 2  ;;  %294 = vpush %v142_v60 }
 0x202   :  { %296 = vpush %v178_v62 }
 0x203   :  { %v190_v1 = vadd.f32 %v189_v0, %v188_v59 }
 0x205   :  { %v191_v3 = vrot.slane %v190_v1, 1 }
 0x207   :  { %v192_v5 = vadd.f32 %v191_v3, %v190_v1 }
 0x209   :  { %298 = vpush %v192_v5 }
 0x20a   :  { %300 = vpush %v212_v6 }
 0x20b   :  { %302 = vpush %v250_v7 }
 0x22a   :  { %s291_s5 = spop %290 }
 0x22b   :  { %s293_s8 = spop %292 }
 0x22c   :  { %s114_s17 = smul.f32 %s293_s8, %s291_s5  ;;  %s354_s5 = smov [#allocation4]  }
 0x232   :  { %s295_s18 = spop %294 }
 0x233   :  { %s160_s19 = smul.f32 %s295_s18, %s293_s8  ;;  %s297_s22 = spop %296 }
 0x234   :  { %s180_s23 = smul.f32 0.125, %s297_s22 }
 0x235   :  { %s161_s20 = sadd.f32 %s160_s19, %s114_s17 }
 0x237   :  { %s162_s21 = smul.f32 0.25, %s161_s20 }
 0x239   :  { %164 = sst [smem:[#allocation2]] %s162_s21 }
 0x23a   :  { %s299_s24 = spop %298 }
 0x23b   :  { %s194_s25 = smul.f32 0.125, %s299_s24  ;;  %s301_s26 = spop %300 }
 0x23c   :  { %s214_s9 = smul.f32 0.125, %s301_s26  ;;  %s303_s27 = spop %302 }
 0x23d   :  { %s195_s0 = sadd.f32 %s194_s25, %s180_s23  ;;  %s252_s28 = smul.f32 0.125, %s303_s27 }
 0x23e   :  { %s215_s2 = smul.f32 2.0, %s214_s9 }
 0x23f   :  { %s196_s10 = smul.f32 0.5, %s195_s0 }
 0x240   :  { %217 = sst [smem:[#allocation2 + $0x2]] %s215_s2  ;;  %s253_s30 = smul.f32 0.7, %s252_s28 }
 0x241   :  { %198 = sst [smem:[#allocation2 + $0x1]] %s196_s10 }
 0x242   :  { %s199_s14 = sadd.f32 %s196_s10, %s162_s21 }
 0x243   :  { %255 = sst [smem:[#allocation2 + $0x3]] %s253_s30 }
 0x244   :  { %s218_s15 = sadd.f32 %s215_s2, %s199_s14 }
 0x245   :  { %267 = dma.smem_to_hbm %s353_s16, 16, %s265_s3, [#allocation3]  }
 0x246   :  { %s256_s7 = sadd.f32 %s253_s30, %s218_s15 }
 0x248   :  { %258 = sst [smem:[#allocation4]] %s256_s7 }
 0x249   :  { %276 = dma.smem_to_hbm %s354_s5, 16, %s274_s13, [#allocation5]  }
 0x24a   :  { %348 = dma.done.wait [#allocation3], 16  }
 0x24b   :  { %349 = vsyncadd [#allocation3], 4294967280 }
 0x24c   :  { %350 = dma.done.wait [#allocation5], 16  }
 0x24d   :  { %351 = vsyncadd [#allocation5], 4294967280 }
 0x24e   :  { %285 = sfence }
 0x24f   :  { %286 = vsyncpa [#allocation3], 1 }
 0x250   :  { %287 = vsyncpa [#allocation5], 1 }

</bundles_post_ra>
